<compile_context>
chip_gen: v6e
topology: v6e:2x2x1
jax: 0.10.0
libtpu: 0.0.40
codegen_flags: <defaults>
</compile_context>

<pallas_src>
import math
import functools

import jax
import jax.numpy as jnp
from jax.experimental import pallas as pl
from jax.experimental.pallas import tpu as pltpu


def _round_up(x, m):
    return ((x + m - 1) // m) * m


def _mlp_kernel(x_ref, w1_ref, b1_ref, w2_ref, b2_ref, o_ref):
    # Linear 1 on the MXU: [TN, Fp](bf16) @ [Fp, Hp](bf16) -> f32 accumulate.
    h = jnp.dot(x_ref[...], w1_ref[...], preferred_element_type=jnp.float32)
    h = h + b1_ref[...]  # (1, Hp) f32 bias, broadcasts over rows

    # Exact GELU (nn.GELU default, erf-based), kept in f32 on the EUP.
    g = 0.5 * h * (1.0 + jax.lax.erf(h * (1.0 / math.sqrt(2.0))))

    # Linear 2 on the MXU: cast activations back to the matmul dtype (bf16).
    out = jnp.dot(g.astype(w2_ref.dtype), w2_ref[...],
                  preferred_element_type=jnp.float32)
    out = out + b2_ref[...]  # (1, Fp) f32 bias

    # Dropout: identity in eval mode.
    # TODO(synk): train-mode dropout would need pltpu.prng_seed/prng_random_bits masking.
    o_ref[...] = out.astype(o_ref.dtype)


@functools.partial(jax.jit, static_argnames=("compute_dtype", "block_rows"))
def mlp_forward(x, w1, b1, w2, b2, *, compute_dtype=jnp.bfloat16, block_rows=256):
    """x: [N, F]; w1: [F, 4F]; b1: [4F]; w2: [4F, F]; b2: [F] (f32 params)."""
    n, f = x.shape
    hidden = w1.shape[1]

    # Lane-dense padding: feature / hidden dims up to multiples of 128.
    fp = _round_up(f, 128)
    hp = _round_up(hidden, 128)

    # Token tile: multiple of 16 (bf16 sublane packing); pad N to a tile multiple.
    tn = block_rows if n >= block_rows else _round_up(n, 16)
    n_pad = _round_up(n, tn)

    # Zero padding is exact: GELU(0) = 0 and zero weight rows/cols contribute
    # nothing; padded output rows/cols are sliced off below.
    xp = jnp.zeros((n_pad, fp), compute_dtype).at[:n, :f].set(x.astype(compute_dtype))
    w1p = jnp.zeros((fp, hp), compute_dtype).at[:f, :hidden].set(w1.astype(compute_dtype))
    w2p = jnp.zeros((hp, fp), compute_dtype).at[:hidden, :f].set(w2.astype(compute_dtype))
    b1p = jnp.zeros((1, hp), jnp.float32).at[0, :hidden].set(b1.astype(jnp.float32))
    b2p = jnp.zeros((1, fp), jnp.float32).at[0, :f].set(b2.astype(jnp.float32))

    grid = (n_pad // tn,)

    # Rough VMEM budget: resident weights (double-buffered by Pallas), x/out
    # tiles (double-buffered) and the f32 hidden intermediate. Only raise the
    # scoped limit if we actually need it; stay under v7x's 64 MiB physical.
    itemsize = jnp.dtype(compute_dtype).itemsize
    vmem_est = (
        2 * (fp * hp + hp * fp) * itemsize   # w1 + w2 buffers
        + 2 * tn * fp * itemsize             # x tiles (double buffer)
        + 2 * tn * fp * 4                    # out tiles (f32, double buffer)
        + 2 * tn * hp * 4                    # h / g intermediates
        + (hp + fp) * 4 * 2                  # biases
    )
    vmem_limit = None
    if vmem_est > (32 << 20):
        vmem_limit = min(int(vmem_est * 1.25), 60 << 20)

    cost = pl.CostEstimate(
        flops=2 * n * f * hidden + 2 * n * hidden * f,
        transcendentals=n * hidden,
        bytes_accessed=(x.size + w1.size + w2.size) * itemsize
        + (b1.size + b2.size) * 4
        + n * f * x.dtype.itemsize,
    )

    out_padded = pl.pallas_call(
        _mlp_kernel,
        out_shape=jax.ShapeDtypeStruct((n_pad, fp), x.dtype),
        grid=grid,
        in_specs=[
            pl.BlockSpec((tn, fp), lambda i: (i, 0)),   # x: tiled over tokens
            pl.BlockSpec((fp, hp), lambda i: (0, 0)),   # w1: VMEM-resident
            pl.BlockSpec((1, hp), lambda i: (0, 0)),    # b1: VMEM-resident
            pl.BlockSpec((hp, fp), lambda i: (0, 0)),   # w2: VMEM-resident
            pl.BlockSpec((1, fp), lambda i: (0, 0)),    # b2: VMEM-resident
        ],
        out_specs=pl.BlockSpec((tn, fp), lambda i: (i, 0)),
        compiler_params=pltpu.CompilerParams(
            dimension_semantics=("parallel",),          # shard token grid across TCs
            vmem_limit_bytes=vmem_limit,
        ),
        cost_estimate=cost,
    )(xp, w1p, b1p, w2p, b2p)

    return out_padded[:n, :f]


def init_mlp_params(key, features, dtype=jnp.float32):
    """Deterministic init mirroring nn.Linear shapes (weights stored transposed)."""
    hidden = features * 4
    k1, k2, k3, k4 = jax.random.split(key, 4)
    bound1 = 1.0 / math.sqrt(features)
    bound2 = 1.0 / math.sqrt(hidden)
    # PyTorch Linear: weight (out, in). We store (in, out) so y = x @ W + b.
    w1 = jax.random.uniform(k1, (features, hidden), dtype, -bound1, bound1)
    b1 = jax.random.uniform(k2, (hidden,), dtype, -bound1, bound1)
    w2 = jax.random.uniform(k3, (hidden, features), dtype, -bound2, bound2)
    b2 = jax.random.uniform(k4, (features,), dtype, -bound2, bound2)
    return w1, b1, w2, b2


if __name__ == "__main__":
    features = 32          # -> hidden = 128
    batch, seq = 2, 8      # 16 tokens total
    dropout_rate = 0.1     # unused at inference (identity)

    key = jax.random.PRNGKey(0)
    kx, kp = jax.random.split(key)
    x = jax.random.normal(kx, (batch, seq, features), jnp.float32)
    w1, b1, w2, b2 = init_mlp_params(kp, features)

    # Flatten (batch, seq) -> tokens for the kernel; unflatten after.
    x2d = x.reshape(batch * seq, features)
    out2d = mlp_forward(x2d, w1, b1, w2, b2)
    out = out2d.reshape(batch, seq, features)
    jax.block_until_ready(out)

    # Reference in plain JAX with matched bf16 quantization of matmul operands
    # (f32 accumulation), exact-erf GELU, eval-mode dropout.
    hi = jax.lax.Precision.HIGHEST
    xq = x2d.astype(jnp.bfloat16).astype(jnp.float32)
    w1q = w1.astype(jnp.bfloat16).astype(jnp.float32)
    w2q = w2.astype(jnp.bfloat16).astype(jnp.float32)
    h_ref = jnp.dot(xq, w1q, precision=hi) + b1
    g_ref = 0.5 * h_ref * (1.0 + jax.lax.erf(h_ref / math.sqrt(2.0)))
    gq = g_ref.astype(jnp.bfloat16).astype(jnp.float32)
    ref = (jnp.dot(gq, w2q, precision=hi) + b2).reshape(batch, seq, features)
    assert jnp.allclose(out, ref, atol=5e-3, rtol=5e-3), (
        float(jnp.max(jnp.abs(out - ref))))

    print("KERNEL_OK")
</pallas_src>

<mosaic_0001>
module attributes {stable_mosaic.version = 11 : i64} {
  func.func @_mlp_kernel(%arg0: i32, %arg1: memref<16x128xbf16, #tpu.memory_space<vmem>>, %arg2: memref<128x128xbf16, #tpu.memory_space<vmem>>, %arg3: memref<1x128xf32, #tpu.memory_space<vmem>>, %arg4: memref<128x128xbf16, #tpu.memory_space<vmem>>, %arg5: memref<1x128xf32, #tpu.memory_space<vmem>>, %arg6: memref<16x128xf32, #tpu.memory_space<vmem>>) attributes {dimension_semantics = [#tpu.dimension_semantics<parallel>], iteration_bounds = array<i64: 1>, scalar_prefetch = 0 : i64, scratch_operands = 0 : i64, tpu.core_type = #tpu.core_type<tc>, window_params = [{transform_indices = @transform_0, window_bounds = array<i64: 16, 128>}, {pipeline_mode = #tpu.pipeline_mode<synchronous>, transform_indices = @transform_1, window_bounds = array<i64: 128, 128>}, {pipeline_mode = #tpu.pipeline_mode<synchronous>, transform_indices = @transform_2, window_bounds = array<i64: 1, 128>}, {pipeline_mode = #tpu.pipeline_mode<synchronous>, transform_indices = @transform_3, window_bounds = array<i64: 128, 128>}, {pipeline_mode = #tpu.pipeline_mode<synchronous>, transform_indices = @transform_4, window_bounds = array<i64: 1, 128>}, {transform_indices = @transform_5, window_bounds = array<i64: 16, 128>}]} {
    %c0 = arith.constant 0 : index
    %c0_0 = arith.constant 0 : index
    %0 = vector.load %arg1[%c0, %c0_0] : memref<16x128xbf16, #tpu.memory_space<vmem>>, vector<16x128xbf16>
    %c0_1 = arith.constant 0 : index
    %c0_2 = arith.constant 0 : index
    %1 = vector.load %arg2[%c0_1, %c0_2] : memref<128x128xbf16, #tpu.memory_space<vmem>>, vector<128x128xbf16>
    %cst = arith.constant dense<0.000000e+00> : vector<16x128xf32>
    %2 = tpu.matmul %0, %1, %cst {dimension_numbers = #tpu.dot_dimension_numbers<[1], [0], [0], [1], [0, 0, 1, 1], [], []>} : vector<16x128xbf16>, vector<128x128xbf16>, vector<16x128xf32> -> vector<16x128xf32>
    %c0_3 = arith.constant 0 : index
    %c0_4 = arith.constant 0 : index
    %3 = vector.load %arg3[%c0_3, %c0_4] : memref<1x128xf32, #tpu.memory_space<vmem>>, vector<1x128xf32>
    %4 = vector.broadcast %3 : vector<1x128xf32> to vector<16x128xf32>
    %5 = arith.addf %2, %4 : vector<16x128xf32>
    %cst_5 = arith.constant 5.000000e-01 : f32
    %6 = vector.broadcast %cst_5 : f32 to vector<16x128xf32>
    %7 = arith.mulf %6, %5 : vector<16x128xf32>
    %cst_6 = arith.constant 0.707106769 : f32
    %8 = vector.broadcast %cst_6 : f32 to vector<16x128xf32>
    %9 = arith.mulf %5, %8 : vector<16x128xf32>
    %10 = math.erf %9 : vector<16x128xf32>
    %cst_7 = arith.constant 1.000000e+00 : f32
    %11 = vector.broadcast %cst_7 : f32 to vector<16x128xf32>
    %12 = arith.addf %11, %10 : vector<16x128xf32>
    %13 = arith.mulf %7, %12 : vector<16x128xf32>
    %14 = arith.truncf %13 : vector<16x128xf32> to vector<16x128xbf16>
    %c0_8 = arith.constant 0 : index
    %c0_9 = arith.constant 0 : index
    %15 = vector.load %arg4[%c0_8, %c0_9] : memref<128x128xbf16, #tpu.memory_space<vmem>>, vector<128x128xbf16>
    %cst_10 = arith.constant dense<0.000000e+00> : vector<16x128xf32>
    %16 = tpu.matmul %14, %15, %cst_10 {dimension_numbers = #tpu.dot_dimension_numbers<[1], [0], [0], [1], [0, 0, 1, 1], [], []>} : vector<16x128xbf16>, vector<128x128xbf16>, vector<16x128xf32> -> vector<16x128xf32>
    %c0_11 = arith.constant 0 : index
    %c0_12 = arith.constant 0 : index
    %17 = vector.load %arg5[%c0_11, %c0_12] : memref<1x128xf32, #tpu.memory_space<vmem>>, vector<1x128xf32>
    %18 = vector.broadcast %17 : vector<1x128xf32> to vector<16x128xf32>
    %19 = arith.addf %16, %18 : vector<16x128xf32>
    %c0_13 = arith.constant 0 : index
    %c0_14 = arith.constant 0 : index
    %20 = vector.load %arg6[%c0_13, %c0_14] : memref<16x128xf32, #tpu.memory_space<vmem>>, vector<16x128xf32>
    tpu.vector_store %arg6[%c0_13, %c0_14], %19 {strides = array<i32>} : memref<16x128xf32, #tpu.memory_space<vmem>>, vector<16x128xf32>,
    return
  }
  func.func @transform_0(%arg0: i32) -> (i32, i32) {
    %c0_i32 = arith.constant 0 : i32
    %c0_i32_0 = arith.constant 0 : i32
    return %arg0, %c0_i32 : i32, i32
  }
  func.func @transform_1(%arg0: i32) -> (i32, i32) {
    %c0_i32 = arith.constant 0 : i32
    %c0_i32_0 = arith.constant 0 : i32
    %c0_i32_1 = arith.constant 0 : i32
    return %c0_i32, %c0_i32_0 : i32, i32
  }
  func.func @transform_2(%arg0: i32) -> (i32, i32) {
    %c0_i32 = arith.constant 0 : i32
    %c0_i32_0 = arith.constant 0 : i32
    %c0_i32_1 = arith.constant 0 : i32
    return %c0_i32, %c0_i32_0 : i32, i32
  }
  func.func @transform_3(%arg0: i32) -> (i32, i32) {
    %c0_i32 = arith.constant 0 : i32
    %c0_i32_0 = arith.constant 0 : i32
    %c0_i32_1 = arith.constant 0 : i32
    return %c0_i32, %c0_i32_0 : i32, i32
  }
  func.func @transform_4(%arg0: i32) -> (i32, i32) {
    %c0_i32 = arith.constant 0 : i32
    %c0_i32_0 = arith.constant 0 : i32
    %c0_i32_1 = arith.constant 0 : i32
    return %c0_i32, %c0_i32_0 : i32, i32
  }
  func.func @transform_5(%arg0: i32) -> (i32, i32) {
    %c0_i32 = arith.constant 0 : i32
    %c0_i32_0 = arith.constant 0 : i32
    return %arg0, %c0_i32 : i32, i32
  }
}

</mosaic_0001>

<bundles_post_ra>
// kernel: mlp_forward.1
= control target key start
LH: loop header
LB: loop body
LE: loop exit
PB: predicated region body
PF: predicated region fallthrough
CT: control target
= control target key end

     0   :  { %v408_v1 = vmov 0.0   ;;  %vm409_vm0 = vmmov 0   ;;  %s503_s0 = inlined_call_operand.vmem [shape: bf16[16,128], index: 0, kind: input, shape index: {}]   ;;  %s504_s1 = inlined_call_operand.vmem [shape: bf16[128,128], index: 1, kind: input, shape index: {}]   ;;  %s505_s2 = inlined_call_operand.vmem [shape: f32[1,128], index: 2, kind: input, shape index: {}]   ;;  %s506_s3 = inlined_call_operand.vmem [shape: bf16[128,128], index: 3, kind: input, shape index: {}]   ;;  %s507_s4 = inlined_call_operand.vmem [shape: f32[1,128], index: 4, kind: input, shape index: {}]   ;;  %s508_s5 = inlined_call_operand.hbm [shape: f32[16,128], index: 5, kind: output, shape index: {}]  }
   0x1   :  { %v365_v0 = vld [vmem:[%s504_s1 + $0x38] sm:$0xff]   ;;  %320 = vmatprep.subr.bf16.mxu0 %v408_v1  ;;  %340 = vmatprep.subr.bf16.mxu1 %v408_v1  ;;  %v366_v2 = vld [vmem:[%s504_s1 + $0x30] sm:$0xff]   ;;  %v367_v3 = vld [vmem:[%s504_s1 + $0x28] sm:$0xff]  }
   0x2   :  { %321 = vmatpush3.bf16.msra.mxu0 %v365_v0  ;;  %336 = vmatprep.mubr.msk.bf16.mxu0 %vm409_vm0, %v408_v1  ;;  %v374_v4 = vld [vmem:[%s506_s3 + $0x38] sm:$0xff]   ;;  %v368_v5 = vld [vmem:[%s504_s1 + $0x20] sm:$0xff]  }
   0x3   :  { %322 = vmatprep.subr.bf16.mxu0 %v408_v1  ;;  %356 = vmatprep.mubr.msk.bf16.mxu1 %vm409_vm0, %v408_v1  ;;  %v369_v6 = vld [vmem:[%s504_s1 + $0x18] sm:$0xff]  }
   0x4   :  { %341 = vmatpush3.bf16.msra.mxu1 %v374_v4 }
   0x5   :  { %342 = vmatprep.subr.bf16.mxu1 %v408_v1 }
   0x6   :  { %323 = vmatpush3.bf16.msra.mxu0 %v366_v2 }
   0x7   :  { %324 = vmatprep.subr.bf16.mxu0 %v408_v1 }
   0xa   :  { %325 = vmatpush3.bf16.msra.mxu0 %v367_v3 }
   0xb   :  { %326 = vmatprep.subr.bf16.mxu0 %v408_v1 }
   0xe   :  { %327 = vmatpush3.bf16.msra.mxu0 %v368_v5 }
   0xf   :  { %328 = vmatprep.subr.bf16.mxu0 %v408_v1 }
  0x10   :  { %10 = vsyncpa [#allocation3], 0  ;;  %v370_v7 = vld [vmem:[%s504_s1 + $0x10] sm:$0xff]   ;;  %v371_v8 = vld [vmem:[%s504_s1 + $0x8] sm:$0xff]   ;;  %s410_s27 = smov [#allocation2]  }
  0x11   :  { %v372_v9 = vld [vmem:[%s504_s1] sm:$0xff]   ;;  %v375_v11 = vld [vmem:[%s506_s3 + $0x30] sm:$0xff]   ;;  %v376_v12 = vld [vmem:[%s506_s3 + $0x28] sm:$0xff]   ;;  %s272_s28 = sshll.u32 %s410_s27, 4  ;;  %s273_s28 = int_to_ptr.vmem [resolvable:$true] %s272_s28 }
  0x12   :  { %329 = vmatpush3.bf16.msra.mxu0 %v369_v6  ;;  %v373_v10 = vld [vmem:[%s503_s0] sm:$0xff]   ;;  %343 = vmatpush3.bf16.msra.mxu1 %v375_v11  ;;  %v378_v14 = vld [vmem:[%s506_s3 + $0x18] sm:$0xff]   ;;  %v379_v15 = vld [vmem:[%s506_s3 + $0x10] sm:$0xff]   ;;  %s386_s29 = scalar_lea.vmem %s273_s28, 256  ;;  %p391_p1 = scmp.lt.s32.totalorder %s273_s28, %s273_s28 }
  0x13   :  { %330 = vmatprep.subr.bf16.mxu0 %v408_v1  ;;  %344 = vmatprep.subr.bf16.mxu1 %v408_v1  ;;  %v377_v13 = vld [vmem:[%s506_s3 + $0x20] sm:$0xff]   ;;  %v380_v16 = vld [vmem:[%s506_s3 + $0x8] sm:$0xff]   ;;  %p387_p0 = scmp.ne.s32.totalorder %s273_s28, %s386_s29  ;;  %p392_p2 = scmp.lt.s32.totalorder %s386_s29, %s386_s29 }
  0x14   :  { %v381_v17 = vld [vmem:[%s506_s3] sm:$0xff]  }
  0x15   :  { %v283_v18 = vld [vmem:[%s505_s2] ss:$0 sm:$0xff]  ;;  %p393_p3 = por %p392_p2, %p391_p1 }
  0x16   :  { %331 = vmatpush3.bf16.msra.mxu0 %v370_v7  ;;  %345 = vmatpush3.bf16.msra.mxu1 %v376_v12  ;;  %v293_v36 = vld [vmem:[%s507_s4] ss:$0 sm:$0xff] }
  0x17   :  { %332 = vmatprep.subr.bf16.mxu0 %v408_v1  ;;  %346 = vmatprep.subr.bf16.mxu1 %v408_v1  ;;  %p394_p4 = pnand %p393_p3, %p387_p0 }
  0x1a   :  { %333 = vmatpush3.bf16.msra.mxu0 %v371_v8  ;;  %347 = vmatpush3.bf16.msra.mxu1 %v377_v13 }
  0x1b   :  { %334 = vmatprep.subr.bf16.mxu0 %v408_v1  ;;  %348 = vmatprep.subr.bf16.mxu1 %v408_v1 }
  0x1e   :  { %335 = vmatpush3.bf16.msra.mxu0 %v372_v9  ;;  %349 = vmatpush3.bf16.msra.mxu1 %v378_v14 }
  0x1f   :  { %350 = vmatprep.subr.bf16.mxu1 %v408_v1 }
  0x21   :  { %337 = vmatmul.mubr.bf16.vlgmr.msra.gmra.mxu0 %v373_v10 }
  0x22   :  { %351 = vmatpush3.bf16.msra.mxu1 %v379_v15 }
  0x23   :  { %352 = vmatprep.subr.bf16.mxu1 %v408_v1 }
  0x26   :  { %353 = vmatpush3.bf16.msra.mxu1 %v380_v16 }
  0x27   :  { %354 = vmatprep.subr.bf16.mxu1 %v408_v1 }
  0x2a   :  { %355 = vmatpush3.bf16.msra.mxu1 %v381_v17 }
  0xe1   :  { %v135_v19 = vpop.f32.mrf.mxu0 }
  0xe2   :  { %v136_v20 = vadd.f32 %v283_v18, %v135_v19 }
  0xe3   :  { %v338_v21 = vpop.f32.mrf.mxu0 }
  0xe4   :  { %v144_v22 = vmul.f32 0.70710677, %v136_v20  ;;  %v142_v30 = vmul.f32 0.5, %v136_v20 }
  0xe5   :  { %v138_v23 = vpop.f32.mrf.mxu0 }
  0xe6   :  { %382 = verf.f32 %v144_v22  ;;  %v139_v24 = vadd.f32 %v283_v18, %v138_v23 }
  0xe7   :  { %v339_v25 = vpop.f32.mrf.mxu0 }
  0xe8   :  { %v145_v26 = vmul.f32 0.70710677, %v139_v24  ;;  %v143_v31 = vmul.f32 0.5, %v139_v24 }
  0xea   :  { %384 = verf.f32 %v145_v26 }
  0xf3   :  { %v383_v27 = vpop.eup %382 }
  0xf4   :  { %v148_v28 = vadd.f32 1.0, %v383_v27 }
  0xf6   :  { %v150_v33 = vmul.f32 %v148_v28, %v142_v30 }
  0xf7   :  { %v385_v29 = vpop.eup %384 }
  0xf8   :  { %v149_v32 = vadd.f32 1.0, %v385_v29 }
  0xfa   :  { %v151_v34 = vmul.f32 %v149_v32, %v143_v31 }
  0xfc   :  { %v152_v35 = vpack.c.bf16 %v151_v34, %v150_v33 }
  0xfe   :  { %357 = vmatmul.mubr.bf16.vlgmr.msra.gmra.mxu1 %v152_v35 }
 0x1be   :  { %v258_v37 = vpop.f32.mrf.mxu1 }
 0x1bf   :  { %v259_v38 = vadd.f32 %v293_v36, %v258_v37 }
 0x1c0   :  { %v358_v39 = vpop.f32.mrf.mxu1 }
 0x1c1   :  { %265 = vst [vmem:[#allocation2] sm:$0xff] %v259_v38 }
 0x1c2   :  { %v261_v40 = vpop.f32.mrf.mxu1 }
 0x1c3   :  { %v262_v41 = vadd.f32 %v293_v36, %v261_v40 }
 0x1c4   :  { %v359_v42 = vpop.f32.mrf.mxu1 }
 0x1c5   :  { %266 = vst [vmem:[#allocation2 + $0x8] sm:$0xff] %v262_v41 }
 0x1c6   :  { %397 = shalt.err (!%p394_p4)
}
 0x1c7   :  { %s411_s30 = smov 128   ;;  %s412_s4 = smov 8  }
 0x1c8   :  { %278 = dma.vmem_to_hbm [thread:$0]  %s273_s28, 256, %s508_s5, [#allocation3], %s411_s30, %s411_s30, %s412_s4  }
 0x1c9   :  { %406 = dma.done.wait [#allocation3], 256  }
 0x1ca   :  { %407 = vsyncadd [#allocation3], 4294967040 }
 0x1cb   :  { %282 = vsyncpa [#allocation3], 1 }

</bundles_post_ra>
